<compile_context>
chip_gen: v5e
topology: v5e:2x2
jax: 0.10.0
libtpu: 0.0.40
codegen_flags: <defaults>
</compile_context>

<pallas_src>
import math

import jax
import jax.numpy as jnp
from jax import lax
from jax.experimental import pallas as pl
from jax.experimental.pallas import tpu as pltpu

# ---------------- configuration (small, consistent with BertConfig) ------------
B = 2            # batch
S = 8            # sequence length
H = 32           # hidden_size
NH = 4           # num_attention_heads
DH = H // NH     # attention_head_size
I = 64           # intermediate_size
LN_EPS = 1e-12   # BertLayerNorm variance epsilon
SCALE = 1.0 / math.sqrt(DH)

# lane-dense width of the packed small-parameter slab (generalizes to production sizes)
VEC_W = ((max(3 * H, I, H) + 127) // 128) * 128


def _layer_norm(x, gamma, beta):
    mu = jnp.mean(x, axis=-1, keepdims=True)
    var = jnp.mean(jnp.square(x - mu), axis=-1, keepdims=True)
    return (x - mu) * lax.rsqrt(var + LN_EPS) * gamma + beta


def _erf_poly(x):
    # Abramowitz & Stegun 7.1.26 (max abs error ~1.5e-7): only exp/mul/add/select,
    # all of which have guaranteed Mosaic lowerings (lax.erf is avoided in-kernel).
    a1, a2, a3, a4, a5 = 0.254829592, -0.284496736, 1.421413741, -1.453152027, 1.061405429
    pp = 0.3275911
    sgn = jnp.where(x >= 0.0, 1.0, -1.0)
    ax = jnp.abs(x)
    t = 1.0 / (1.0 + pp * ax)
    poly = ((((a5 * t + a4) * t + a3) * t + a2) * t + a1) * t
    return sgn * (1.0 - poly * jnp.exp(-ax * ax))


def _gelu_kernel(x):
    # BERT / UniLM exact gelu: x * 0.5 * (1 + erf(x / sqrt(2))), erf via A&S polynomial.
    return x * 0.5 * (1.0 + _erf_poly(x * (1.0 / math.sqrt(2.0))))


def _gelu_ref(x):
    return x * 0.5 * (1.0 + lax.erf(x / math.sqrt(2.0)))


# ------------------------------- fused kernel ----------------------------------
def bert_layer_kernel(x_ref, mask_ref, wqkv_ref, wo_ref, w1_ref, w2_ref,
                      vecs_ref, out_ref):
    x = x_ref[...]                            # (S, H) rows of this batch element
    mask = mask_ref[...]                      # (S, S) additive attention mask

    vecs = vecs_ref[...]                      # (8, VEC_W) packed small params
    bqkv = vecs[0:1, 0:3 * H]                 # (1, 3H)  (Q part pre-scaled by 1/sqrt(DH))
    b1 = vecs[1:2, 0:I]                       # (1, I)
    bo = vecs[2:3, 0:H]
    g1 = vecs[3:4, 0:H]
    be1 = vecs[4:5, 0:H]
    b2 = vecs[5:6, 0:H]
    g2 = vecs[6:7, 0:H]
    be2 = vecs[7:8, 0:H]

    # ---- fused QKV projection (SCALE already folded into the Q weight columns) ----
    qkv = jnp.dot(x, wqkv_ref[...], preferred_element_type=jnp.float32) + bqkv   # (S, 3H)

    # ---- per-head scaled-dot-product attention, folded into the output projection ----
    #   proj = sum_h softmax(q_h k_h^T + mask) v_h @ wo[h*DH:(h+1)*DH, :]
    # (block-matmul identity) -> no lane-concat and no masked sub-lane stores at all.
    proj = jnp.zeros((S, H), jnp.float32)
    for h in range(NH):                       # NH=4, static unrolled
        qh = qkv[:, h * DH:(h + 1) * DH]                              # (S, DH), pre-scaled
        kh = qkv[:, H + h * DH:H + (h + 1) * DH]                      # (S, DH)
        vh = qkv[:, 2 * H + h * DH:2 * H + (h + 1) * DH]              # (S, DH)
        s = jnp.einsum('qd,kd->qk', qh, kh,
                       preferred_element_type=jnp.float32) + mask     # (S, S)
        s = s - jnp.max(s, axis=-1, keepdims=True)
        e = jnp.exp(s)
        p = e * pl.reciprocal(jnp.sum(e, axis=-1, keepdims=True), approx=True)
        ctx_h = jnp.dot(p, vh, preferred_element_type=jnp.float32)    # (S, DH)
        proj = proj + jnp.dot(ctx_h, wo_ref[h * DH:(h + 1) * DH, :],
                              preferred_element_type=jnp.float32)     # (S, H)
    proj = proj + bo

    # ---- residual + LayerNorm 1 (BertSelfOutput) ----
    attn_out = _layer_norm(proj + x, g1, be1)                          # (S, H)

    # ---- FFN: intermediate dense + exact-erf GELU, output dense, residual + LN2 ----
    inter = _gelu_kernel(jnp.dot(attn_out, w1_ref[...],
                                 preferred_element_type=jnp.float32) + b1)   # (S, I)
    ffn = jnp.dot(inter, w2_ref[...], preferred_element_type=jnp.float32) + b2
    out_ref[...] = _layer_norm(ffn + attn_out, g2, be2)                # (S, H)


# ------------------------------- wrapper ----------------------------------------
def bert_layer_pallas(hidden, mask, p):
    # One-time weight-pack transforms (in production done at weight-load time):
    # fuse Wq/Wk/Wv into one (H, 3H) weight, fold SCALE into the Q columns / Q bias,
    # and pack the ten tiny bias / LayerNorm vectors into one lane-dense slab.
    wqkv = jnp.concatenate([p["wq"] * SCALE, p["wk"], p["wv"]], axis=1)      # (H, 3H)
    bqkv = jnp.concatenate([p["bq"][0] * SCALE, p["bk"][0], p["bv"][0]])     # (3H,)

    vecs = jnp.zeros((8, VEC_W), jnp.float32)
    vecs = vecs.at[0, 0:3 * H].set(bqkv)
    vecs = vecs.at[1, 0:I].set(p["b1"][0])
    vecs = vecs.at[2, 0:H].set(p["bo"][0])
    vecs = vecs.at[3, 0:H].set(p["ln1_g"][0])
    vecs = vecs.at[4, 0:H].set(p["ln1_b"][0])
    vecs = vecs.at[5, 0:H].set(p["b2"][0])
    vecs = vecs.at[6, 0:H].set(p["ln2_g"][0])
    vecs = vecs.at[7, 0:H].set(p["ln2_b"][0])

    hidden2d = hidden.reshape(B * S, H)       # lane-contiguous row view for the kernel

    grid_spec = pltpu.PrefetchScalarGridSpec(
        num_scalar_prefetch=0,
        grid=(B,),                            # one batch element per grid step
        in_specs=[
            # activations / mask: one batch element per step
            pl.BlockSpec((S, H), lambda b: (b, 0)),
            pl.BlockSpec((None, S, S), lambda b: (b, 0, 0)),
            # weights: index map ignores the grid axis -> DMA'd once, VMEM-resident
            pl.BlockSpec((H, 3 * H), lambda b: (0, 0)),
            pl.BlockSpec((H, H), lambda b: (0, 0)),
            pl.BlockSpec((H, I), lambda b: (0, 0)),
            pl.BlockSpec((I, H), lambda b: (0, 0)),
            pl.BlockSpec((8, VEC_W), lambda b: (0, 0)),
        ],
        out_specs=pl.BlockSpec((S, H), lambda b: (b, 0)),
    )

    out2d = pl.pallas_call(
        bert_layer_kernel,
        out_shape=jax.ShapeDtypeStruct((B * S, H), jnp.float32),
        grid_spec=grid_spec,
        compiler_params=pltpu.CompilerParams(
            dimension_semantics=("parallel",),      # shard batch across TCs on v7x
            vmem_limit_bytes=64 * 1024 * 1024),
    )(hidden2d, mask, wqkv, p["wo"], p["w1"], p["w2"], vecs)

    return out2d.reshape(B, S, H)


# ------------------------------ pure-JAX reference ------------------------------
def bert_layer_ref(hidden, mask, p):
    q = hidden @ p["wq"] + p["bq"][0]
    k = hidden @ p["wk"] + p["bk"][0]
    v = hidden @ p["wv"] + p["bv"][0]

    def split(x):  # (B,S,H) -> (B,NH,S,DH)
        return x.reshape(B, S, NH, DH).transpose(0, 2, 1, 3)

    qh, kh, vh = split(q), split(k), split(v)
    scores = jnp.einsum("bhqd,bhkd->bhqk", qh * SCALE, kh) + mask[:, None, :, :]
    probs = jax.nn.softmax(scores, axis=-1)
    ctx = jnp.einsum("bhqk,bhkd->bhqd", probs, vh)
    ctx = ctx.transpose(0, 2, 1, 3).reshape(B, S, H)

    attn_out = _layer_norm(ctx @ p["wo"] + p["bo"][0] + hidden,
                           p["ln1_g"][0], p["ln1_b"][0])
    inter = _gelu_ref(attn_out @ p["w1"] + p["b1"][0])
    return _layer_norm(inter @ p["w2"] + p["b2"][0] + attn_out,
                       p["ln2_g"][0], p["ln2_b"][0])


# ---------------------------------- main -----------------------------------------
if __name__ == "__main__":
    key = jax.random.PRNGKey(0)
    keys = jax.random.split(key, 20)

    def nrm(k, shape, scale=0.02):
        return (scale * jax.random.normal(k, shape)).astype(jnp.float32)

    params = {
        "wq": nrm(keys[0], (H, H)), "bq": nrm(keys[1], (1, H)),
        "wk": nrm(keys[2], (H, H)), "bk": nrm(keys[3], (1, H)),
        "wv": nrm(keys[4], (H, H)), "bv": nrm(keys[5], (1, H)),
        "wo": nrm(keys[6], (H, H)), "bo": nrm(keys[7], (1, H)),
        "ln1_g": (1.0 + nrm(keys[8], (1, H), 0.1)), "ln1_b": nrm(keys[9], (1, H), 0.1),
        "w1": nrm(keys[10], (H, I)), "b1": nrm(keys[11], (1, I)),
        "w2": nrm(keys[12], (I, H)), "b2": nrm(keys[13], (1, H)),
        "ln2_g": (1.0 + nrm(keys[14], (1, H), 0.1)), "ln2_b": nrm(keys[15], (1, H), 0.1),
    }

    hidden = nrm(keys[16], (B, S, H), 1.0)
    # additive attention mask: 0 for visible, -10000 for masked (last 2 tokens of batch 1)
    mask = jnp.zeros((B, S, S), dtype=jnp.float32)
    mask = mask.at[1, :, S - 2:].set(-10000.0)

    out = bert_layer_pallas(hidden, mask, params)
    out = jax.block_until_ready(out)

    ref = bert_layer_ref(hidden, mask, params)
    assert out.shape == (B, S, H)
    # 1e-3 tolerance: the kernel uses the EUP approximate reciprocal for the softmax
    # denominator and a ~1.5e-7-accurate erf polynomial; both are orders of magnitude
    # tighter than any real-bug error.
    assert jnp.allclose(out, ref, rtol=1e-3, atol=1e-3), "Pallas output mismatch vs reference"

    print("KERNEL_OK")
</pallas_src>

<mosaic_0001>
module attributes {stable_mosaic.version = 11 : i64} {
  func.func @bert_layer_kernel(%arg0: i32, %arg1: memref<8x32xf32, #tpu.memory_space<vmem>>, %arg2: memref<1x8x8xf32, #tpu.memory_space<vmem>>, %arg3: memref<32x96xf32, #tpu.memory_space<vmem>>, %arg4: memref<32x32xf32, #tpu.memory_space<vmem>>, %arg5: memref<32x64xf32, #tpu.memory_space<vmem>>, %arg6: memref<64x32xf32, #tpu.memory_space<vmem>>, %arg7: memref<8x128xf32, #tpu.memory_space<vmem>>, %arg8: memref<8x32xf32, #tpu.memory_space<vmem>>) attributes {dimension_semantics = [#tpu.dimension_semantics<parallel>], iteration_bounds = array<i64: 2>, scalar_prefetch = 0 : i64, scratch_operands = 0 : i64, tpu.core_type = #tpu.core_type<tc>, window_params = [{transform_indices = @transform_0, window_bounds = array<i64: 8, 32>}, {transform_indices = @transform_1, window_bounds = array<i64: 1, 8, 8>}, {pipeline_mode = #tpu.pipeline_mode<synchronous>, transform_indices = @transform_2, window_bounds = array<i64: 32, 96>}, {pipeline_mode = #tpu.pipeline_mode<synchronous>, transform_indices = @transform_3, window_bounds = array<i64: 32, 32>}, {pipeline_mode = #tpu.pipeline_mode<synchronous>, transform_indices = @transform_4, window_bounds = array<i64: 32, 64>}, {pipeline_mode = #tpu.pipeline_mode<synchronous>, transform_indices = @transform_5, window_bounds = array<i64: 64, 32>}, {pipeline_mode = #tpu.pipeline_mode<synchronous>, transform_indices = @transform_6, window_bounds = array<i64: 8, 128>}, {transform_indices = @transform_7, window_bounds = array<i64: 8, 32>}]} {
    %c0 = arith.constant 0 : index
    %c0_0 = arith.constant 0 : index
    %0 = vector.load %arg1[%c0, %c0_0] : memref<8x32xf32, #tpu.memory_space<vmem>>, vector<8x32xf32>
    %c0_1 = arith.constant 0 : index
    %c0_2 = arith.constant 0 : index
    %c0_3 = arith.constant 0 : index
    %1 = vector.load %arg2[%c0_1, %c0_2, %c0_3] : memref<1x8x8xf32, #tpu.memory_space<vmem>>, vector<1x8x8xf32>
    %2 = vector.shape_cast %1 : vector<1x8x8xf32> to vector<8x8xf32>
    %c0_4 = arith.constant 0 : index
    %c0_5 = arith.constant 0 : index
    %3 = vector.load %arg7[%c0_4, %c0_5] : memref<8x128xf32, #tpu.memory_space<vmem>>, vector<8x128xf32>
    %4 = vector.extract_strided_slice %3 {offsets = [0, 0], sizes = [1, 96], strides = [1, 1]} : vector<8x128xf32> to vector<1x96xf32>
    %5 = vector.extract_strided_slice %3 {offsets = [1, 0], sizes = [1, 64], strides = [1, 1]} : vector<8x128xf32> to vector<1x64xf32>
    %6 = vector.extract_strided_slice %3 {offsets = [2, 0], sizes = [1, 32], strides = [1, 1]} : vector<8x128xf32> to vector<1x32xf32>
    %7 = vector.extract_strided_slice %3 {offsets = [3, 0], sizes = [1, 32], strides = [1, 1]} : vector<8x128xf32> to vector<1x32xf32>
    %8 = vector.extract_strided_slice %3 {offsets = [4, 0], sizes = [1, 32], strides = [1, 1]} : vector<8x128xf32> to vector<1x32xf32>
    %9 = vector.extract_strided_slice %3 {offsets = [5, 0], sizes = [1, 32], strides = [1, 1]} : vector<8x128xf32> to vector<1x32xf32>
    %10 = vector.extract_strided_slice %3 {offsets = [6, 0], sizes = [1, 32], strides = [1, 1]} : vector<8x128xf32> to vector<1x32xf32>
    %11 = vector.extract_strided_slice %3 {offsets = [7, 0], sizes = [1, 32], strides = [1, 1]} : vector<8x128xf32> to vector<1x32xf32>
    %c0_6 = arith.constant 0 : index
    %c0_7 = arith.constant 0 : index
    %12 = vector.load %arg3[%c0_6, %c0_7] : memref<32x96xf32, #tpu.memory_space<vmem>>, vector<32x96xf32>
    %cst = arith.constant dense<0.000000e+00> : vector<8x96xf32>
    %13 = tpu.matmul %0, %12, %cst {dimension_numbers = #tpu.dot_dimension_numbers<[1], [0], [0], [1], [0, 0, 1, 1], [], []>} : vector<8x32xf32>, vector<32x96xf32>, vector<8x96xf32> -> vector<8x96xf32>
    %14 = vector.broadcast %4 : vector<1x96xf32> to vector<8x96xf32>
    %15 = arith.addf %13, %14 : vector<8x96xf32>
    %cst_8 = arith.constant 0.000000e+00 : f32
    %16 = vector.broadcast %cst_8 : f32 to vector<8x32xf32>
    %17 = vector.extract_strided_slice %15 {offsets = [0, 0], sizes = [8, 8], strides = [1, 1]} : vector<8x96xf32> to vector<8x8xf32>
    %18 = vector.extract_strided_slice %15 {offsets = [0, 32], sizes = [8, 8], strides = [1, 1]} : vector<8x96xf32> to vector<8x8xf32>
    %19 = vector.extract_strided_slice %15 {offsets = [0, 64], sizes = [8, 8], strides = [1, 1]} : vector<8x96xf32> to vector<8x8xf32>
    "tpu.trace_start"() <{level = 10 : i32, message = "qd,kd->qk"}> : () -> ()
    %cst_9 = arith.constant dense<0.000000e+00> : vector<8x8xf32>
    %20 = tpu.matmul %17, %18, %cst_9 {dimension_numbers = #tpu.dot_dimension_numbers<[1], [1], [0], [0], [0, 0, 1, 0], [], []>} : vector<8x8xf32>, vector<8x8xf32>, vector<8x8xf32> -> vector<8x8xf32>
    "tpu.trace_stop"() : () -> ()
    %21 = arith.addf %20, %2 : vector<8x8xf32>
    %cst_10 = arith.constant dense<0xFF800000> : vector<8xf32>
    %22 = vector.multi_reduction <maximumf>, %21, %cst_10 [1] : vector<8x8xf32> to vector<8xf32>
    %23 = vector.shape_cast %22 : vector<8xf32> to vector<8x1xf32>
    %24 = vector.broadcast %23 : vector<8x1xf32> to vector<8x8xf32>
    %25 = arith.subf %21, %24 : vector<8x8xf32>
    %26 = math.exp %25 : vector<8x8xf32>
    %cst_11 = arith.constant dense<0.000000e+00> : vector<8xf32>
    %27 = vector.multi_reduction <add>, %26, %cst_11 [1] : vector<8x8xf32> to vector<8xf32>
    %28 = vector.shape_cast %27 : vector<8xf32> to vector<8x1xf32>
    %29 = tpu.reciprocal %28 {approx = true} : vector<8x1xf32> -> vector<8x1xf32>
    %30 = vector.broadcast %29 : vector<8x1xf32> to vector<8x8xf32>
    %31 = arith.mulf %26, %30 : vector<8x8xf32>
    %cst_12 = arith.constant dense<0.000000e+00> : vector<8x8xf32>
    %32 = tpu.matmul %31, %19, %cst_12 {dimension_numbers = #tpu.dot_dimension_numbers<[1], [0], [0], [1], [0, 0, 1, 1], [], []>} : vector<8x8xf32>, vector<8x8xf32>, vector<8x8xf32> -> vector<8x8xf32>
    %c0_13 = arith.constant 0 : index
    %c0_14 = arith.constant 0 : index
    %33 = vector.load %arg4[%c0_13, %c0_14] : memref<32x32xf32, #tpu.memory_space<vmem>>, vector<8x32xf32>
    %cst_15 = arith.constant dense<0.000000e+00> : vector<8x32xf32>
    %34 = tpu.matmul %32, %33, %cst_15 {dimension_numbers = #tpu.dot_dimension_numbers<[1], [0], [0], [1], [0, 0, 1, 1], [], []>} : vector<8x8xf32>, vector<8x32xf32>, vector<8x32xf32> -> vector<8x32xf32>
    %35 = arith.addf %16, %34 : vector<8x32xf32>
    %36 = vector.extract_strided_slice %15 {offsets = [0, 8], sizes = [8, 8], strides = [1, 1]} : vector<8x96xf32> to vector<8x8xf32>
    %37 = vector.extract_strided_slice %15 {offsets = [0, 40], sizes = [8, 8], strides = [1, 1]} : vector<8x96xf32> to vector<8x8xf32>
    %38 = vector.extract_strided_slice %15 {offsets = [0, 72], sizes = [8, 8], strides = [1, 1]} : vector<8x96xf32> to vector<8x8xf32>
    "tpu.trace_start"() <{level = 10 : i32, message = "qd,kd->qk"}> : () -> ()
    %cst_16 = arith.constant dense<0.000000e+00> : vector<8x8xf32>
    %39 = tpu.matmul %36, %37, %cst_16 {dimension_numbers = #tpu.dot_dimension_numbers<[1], [1], [0], [0], [0, 0, 1, 0], [], []>} : vector<8x8xf32>, vector<8x8xf32>, vector<8x8xf32> -> vector<8x8xf32>
    "tpu.trace_stop"() : () -> ()
    %40 = arith.addf %39, %2 : vector<8x8xf32>
    %cst_17 = arith.constant dense<0xFF800000> : vector<8xf32>
    %41 = vector.multi_reduction <maximumf>, %40, %cst_17 [1] : vector<8x8xf32> to vector<8xf32>
    %42 = vector.shape_cast %41 : vector<8xf32> to vector<8x1xf32>
    %43 = vector.broadcast %42 : vector<8x1xf32> to vector<8x8xf32>
    %44 = arith.subf %40, %43 : vector<8x8xf32>
    %45 = math.exp %44 : vector<8x8xf32>
    %cst_18 = arith.constant dense<0.000000e+00> : vector<8xf32>
    %46 = vector.multi_reduction <add>, %45, %cst_18 [1] : vector<8x8xf32> to vector<8xf32>
    %47 = vector.shape_cast %46 : vector<8xf32> to vector<8x1xf32>
    %48 = tpu.reciprocal %47 {approx = true} : vector<8x1xf32> -> vector<8x1xf32>
    %49 = vector.broadcast %48 : vector<8x1xf32> to vector<8x8xf32>
    %50 = arith.mulf %45, %49 : vector<8x8xf32>
    %cst_19 = arith.constant dense<0.000000e+00> : vector<8x8xf32>
    %51 = tpu.matmul %50, %38, %cst_19 {dimension_numbers = #tpu.dot_dimension_numbers<[1], [0], [0], [1], [0, 0, 1, 1], [], []>} : vector<8x8xf32>, vector<8x8xf32>, vector<8x8xf32> -> vector<8x8xf32>
    %c8 = arith.constant 8 : index
    %c0_20 = arith.constant 0 : index
    %52 = vector.load %arg4[%c8, %c0_20] : memref<32x32xf32, #tpu.memory_space<vmem>>, vector<8x32xf32>
    %cst_21 = arith.constant dense<0.000000e+00> : vector<8x32xf32>
    %53 = tpu.matmul %51, %52, %cst_21 {dimension_numbers = #tpu.dot_dimension_numbers<[1], [0], [0], [1], [0, 0, 1, 1], [], []>} : vector<8x8xf32>, vector<8x32xf32>, vector<8x32xf32> -> vector<8x32xf32>
    %54 = arith.addf %35, %53 : vector<8x32xf32>
    %55 = vector.extract_strided_slice %15 {offsets = [0, 16], sizes = [8, 8], strides = [1, 1]} : vector<8x96xf32> to vector<8x8xf32>
    %56 = vector.extract_strided_slice %15 {offsets = [0, 48], sizes = [8, 8], strides = [1, 1]} : vector<8x96xf32> to vector<8x8xf32>
    %57 = vector.extract_strided_slice %15 {offsets = [0, 80], sizes = [8, 8], strides = [1, 1]} : vector<8x96xf32> to vector<8x8xf32>
    "tpu.trace_start"() <{level = 10 : i32, message = "qd,kd->qk"}> : () -> ()
    %cst_22 = arith.constant dense<0.000000e+00> : vector<8x8xf32>
    %58 = tpu.matmul %55, %56, %cst_22 {dimension_numbers = #tpu.dot_dimension_numbers<[1], [1], [0], [0], [0, 0, 1, 0], [], []>} : vector<8x8xf32>, vector<8x8xf32>, vector<8x8xf32> -> vector<8x8xf32>
    "tpu.trace_stop"() : () -> ()
    %59 = arith.addf %58, %2 : vector<8x8xf32>
    %cst_23 = arith.constant dense<0xFF800000> : vector<8xf32>
    %60 = vector.multi_reduction <maximumf>, %59, %cst_23 [1] : vector<8x8xf32> to vector<8xf32>
    %61 = vector.shape_cast %60 : vector<8xf32> to vector<8x1xf32>
    %62 = vector.broadcast %61 : vector<8x1xf32> to vector<8x8xf32>
    %63 = arith.subf %59, %62 : vector<8x8xf32>
    %64 = math.exp %63 : vector<8x8xf32>
    %cst_24 = arith.constant dense<0.000000e+00> : vector<8xf32>
    %65 = vector.multi_reduction <add>, %64, %cst_24 [1] : vector<8x8xf32> to vector<8xf32>
    %66 = vector.shape_cast %65 : vector<8xf32> to vector<8x1xf32>
    %67 = tpu.reciprocal %66 {approx = true} : vector<8x1xf32> -> vector<8x1xf32>
    %68 = vector.broadcast %67 : vector<8x1xf32> to vector<8x8xf32>
    %69 = arith.mulf %64, %68 : vector<8x8xf32>
    %cst_25 = arith.constant dense<0.000000e+00> : vector<8x8xf32>
    %70 = tpu.matmul %69, %57, %cst_25 {dimension_numbers = #tpu.dot_dimension_numbers<[1], [0], [0], [1], [0, 0, 1, 1], [], []>} : vector<8x8xf32>, vector<8x8xf32>, vector<8x8xf32> -> vector<8x8xf32>
    %c16 = arith.constant 16 : index
    %c0_26 = arith.constant 0 : index
    %71 = vector.load %arg4[%c16, %c0_26] : memref<32x32xf32, #tpu.memory_space<vmem>>, vector<8x32xf32>
    %cst_27 = arith.constant dense<0.000000e+00> : vector<8x32xf32>
    %72 = tpu.matmul %70, %71, %cst_27 {dimension_numbers = #tpu.dot_dimension_numbers<[1], [0], [0], [1], [0, 0, 1, 1], [], []>} : vector<8x8xf32>, vector<8x32xf32>, vector<8x32xf32> -> vector<8x32xf32>
    %73 = arith.addf %54, %72 : vector<8x32xf32>
    %74 = vector.extract_strided_slice %15 {offsets = [0, 24], sizes = [8, 8], strides = [1, 1]} : vector<8x96xf32> to vector<8x8xf32>
    %75 = vector.extract_strided_slice %15 {offsets = [0, 56], sizes = [8, 8], strides = [1, 1]} : vector<8x96xf32> to vector<8x8xf32>
    %76 = vector.extract_strided_slice %15 {offsets = [0, 88], sizes = [8, 8], strides = [1, 1]} : vector<8x96xf32> to vector<8x8xf32>
    "tpu.trace_start"() <{level = 10 : i32, message = "qd,kd->qk"}> : () -> ()
    %cst_28 = arith.constant dense<0.000000e+00> : vector<8x8xf32>
    %77 = tpu.matmul %74, %75, %cst_28 {dimension_numbers = #tpu.dot_dimension_numbers<[1], [1], [0], [0], [0, 0, 1, 0], [], []>} : vector<8x8xf32>, vector<8x8xf32>, vector<8x8xf32> -> vector<8x8xf32>
    "tpu.trace_stop"() : () -> ()
    %78 = arith.addf %77, %2 : vector<8x8xf32>
    %cst_29 = arith.constant dense<0xFF800000> : vector<8xf32>
    %79 = vector.multi_reduction <maximumf>, %78, %cst_29 [1] : vector<8x8xf32> to vector<8xf32>
    %80 = vector.shape_cast %79 : vector<8xf32> to vector<8x1xf32>
    %81 = vector.broadcast %80 : vector<8x1xf32> to vector<8x8xf32>
    %82 = arith.subf %78, %81 : vector<8x8xf32>
    %83 = math.exp %82 : vector<8x8xf32>
    %cst_30 = arith.constant dense<0.000000e+00> : vector<8xf32>
    %84 = vector.multi_reduction <add>, %83, %cst_30 [1] : vector<8x8xf32> to vector<8xf32>
    %85 = vector.shape_cast %84 : vector<8xf32> to vector<8x1xf32>
    %86 = tpu.reciprocal %85 {approx = true} : vector<8x1xf32> -> vector<8x1xf32>
    %87 = vector.broadcast %86 : vector<8x1xf32> to vector<8x8xf32>
    %88 = arith.mulf %83, %87 : vector<8x8xf32>
    %cst_31 = arith.constant dense<0.000000e+00> : vector<8x8xf32>
    %89 = tpu.matmul %88, %76, %cst_31 {dimension_numbers = #tpu.dot_dimension_numbers<[1], [0], [0], [1], [0, 0, 1, 1], [], []>} : vector<8x8xf32>, vector<8x8xf32>, vector<8x8xf32> -> vector<8x8xf32>
    %c24 = arith.constant 24 : index
    %c0_32 = arith.constant 0 : index
    %90 = vector.load %arg4[%c24, %c0_32] : memref<32x32xf32, #tpu.memory_space<vmem>>, vector<8x32xf32>
    %cst_33 = arith.constant dense<0.000000e+00> : vector<8x32xf32>
    %91 = tpu.matmul %89, %90, %cst_33 {dimension_numbers = #tpu.dot_dimension_numbers<[1], [0], [0], [1], [0, 0, 1, 1], [], []>} : vector<8x8xf32>, vector<8x32xf32>, vector<8x32xf32> -> vector<8x32xf32>
    %92 = arith.addf %73, %91 : vector<8x32xf32>
    %93 = vector.broadcast %6 : vector<1x32xf32> to vector<8x32xf32>
    %94 = arith.addf %92, %93 : vector<8x32xf32>
    %95 = arith.addf %94, %0 : vector<8x32xf32>
    %cst_34 = arith.constant dense<0.000000e+00> : vector<8xf32>
    %96 = vector.multi_reduction <add>, %95, %cst_34 [1] : vector<8x32xf32> to vector<8xf32>
    %97 = vector.shape_cast %96 : vector<8xf32> to vector<8x1xf32>
    %cst_35 = arith.constant 3.200000e+01 : f32
    %98 = vector.broadcast %cst_35 : f32 to vector<8x1xf32>
    %99 = arith.divf %97, %98 : vector<8x1xf32>
    %100 = vector.broadcast %99 : vector<8x1xf32> to vector<8x32xf32>
    %101 = arith.subf %95, %100 : vector<8x32xf32>
    %102 = arith.mulf %101, %101 : vector<8x32xf32>
    %cst_36 = arith.constant dense<0.000000e+00> : vector<8xf32>
    %103 = vector.multi_reduction <add>, %102, %cst_36 [1] : vector<8x32xf32> to vector<8xf32>
    %104 = vector.shape_cast %103 : vector<8xf32> to vector<8x1xf32>
    %cst_37 = arith.constant 3.200000e+01 : f32
    %105 = vector.broadcast %cst_37 : f32 to vector<8x1xf32>
    %106 = arith.divf %104, %105 : vector<8x1xf32>
    %107 = vector.broadcast %99 : vector<8x1xf32> to vector<8x32xf32>
    %108 = arith.subf %95, %107 : vector<8x32xf32>
    %cst_38 = arith.constant 9.99999996E-13 : f32
    %109 = vector.broadcast %cst_38 : f32 to vector<8x1xf32>
    %110 = arith.addf %106, %109 : vector<8x1xf32>
    %111 = math.rsqrt %110 : vector<8x1xf32>
    %112 = vector.broadcast %111 : vector<8x1xf32> to vector<8x32xf32>
    %113 = arith.mulf %108, %112 : vector<8x32xf32>
    %114 = vector.broadcast %7 : vector<1x32xf32> to vector<8x32xf32>
    %115 = arith.mulf %113, %114 : vector<8x32xf32>
    %116 = vector.broadcast %8 : vector<1x32xf32> to vector<8x32xf32>
    %117 = arith.addf %115, %116 : vector<8x32xf32>
    %c0_39 = arith.constant 0 : index
    %c0_40 = arith.constant 0 : index
    %118 = vector.load %arg5[%c0_39, %c0_40] : memref<32x64xf32, #tpu.memory_space<vmem>>, vector<32x64xf32>
    %cst_41 = arith.constant dense<0.000000e+00> : vector<8x64xf32>
    %119 = tpu.matmul %117, %118, %cst_41 {dimension_numbers = #tpu.dot_dimension_numbers<[1], [0], [0], [1], [0, 0, 1, 1], [], []>} : vector<8x32xf32>, vector<32x64xf32>, vector<8x64xf32> -> vector<8x64xf32>
    %120 = vector.broadcast %5 : vector<1x64xf32> to vector<8x64xf32>
    %121 = arith.addf %119, %120 : vector<8x64xf32>
    %cst_42 = arith.constant 5.000000e-01 : f32
    %122 = vector.broadcast %cst_42 : f32 to vector<8x64xf32>
    %123 = arith.mulf %121, %122 : vector<8x64xf32>
    %cst_43 = arith.constant 0.707106769 : f32
    %124 = vector.broadcast %cst_43 : f32 to vector<8x64xf32>
    %125 = arith.mulf %121, %124 : vector<8x64xf32>
    %cst_44 = arith.constant 0.000000e+00 : f32
    %126 = vector.broadcast %cst_44 : f32 to vector<8x64xf32>
    %127 = arith.cmpf oge, %125, %126 : vector<8x64xf32>
    %cst_45 = arith.constant 1.000000e+00 : f32
    %cst_46 = arith.constant -1.000000e+00 : f32
    %128 = vector.broadcast %cst_45 : f32 to vector<8x64xf32>
    %129 = vector.broadcast %cst_46 : f32 to vector<8x64xf32>
    %130 = arith.select %127, %128, %129 : vector<8x64xi1>, vector<8x64xf32>
    %131 = math.absf %125 : vector<8x64xf32>
    %cst_47 = arith.constant 0.327591091 : f32
    %132 = vector.broadcast %cst_47 : f32 to vector<8x64xf32>
    %133 = arith.mulf %132, %131 : vector<8x64xf32>
    %cst_48 = arith.constant 1.000000e+00 : f32
    %134 = vector.broadcast %cst_48 : f32 to vector<8x64xf32>
    %135 = arith.addf %134, %133 : vector<8x64xf32>
    %cst_49 = arith.constant 1.000000e+00 : f32
    %136 = vector.broadcast %cst_49 : f32 to vector<8x64xf32>
    %137 = arith.divf %136, %135 : vector<8x64xf32>
    %cst_50 = arith.constant 1.06140542 : f32
    %138 = vector.broadcast %cst_50 : f32 to vector<8x64xf32>
    %139 = arith.mulf %138, %137 : vector<8x64xf32>
    %cst_51 = arith.constant -1.45315206 : f32
    %140 = vector.broadcast %cst_51 : f32 to vector<8x64xf32>
    %141 = arith.addf %139, %140 : vector<8x64xf32>
    %142 = arith.mulf %141, %137 : vector<8x64xf32>
    %cst_52 = arith.constant 1.42141378 : f32
    %143 = vector.broadcast %cst_52 : f32 to vector<8x64xf32>
    %144 = arith.addf %142, %143 : vector<8x64xf32>
    %145 = arith.mulf %144, %137 : vector<8x64xf32>
    %cst_53 = arith.constant -0.284496725 : f32
    %146 = vector.broadcast %cst_53 : f32 to vector<8x64xf32>
    %147 = arith.addf %145, %146 : vector<8x64xf32>
    %148 = arith.mulf %147, %137 : vector<8x64xf32>
    %cst_54 = arith.constant 0.254829586 : f32
    %149 = vector.broadcast %cst_54 : f32 to vector<8x64xf32>
    %150 = arith.addf %148, %149 : vector<8x64xf32>
    %151 = arith.mulf %150, %137 : vector<8x64xf32>
    %cst_55 = arith.constant 0.000000e+00 : f32
    %152 = vector.broadcast %cst_55 : f32 to vector<8x64xf32>
    %153 = arith.subf %152, %131 : vector<8x64xf32>
    %154 = arith.mulf %153, %131 : vector<8x64xf32>
    %155 = math.exp %154 : vector<8x64xf32>
    %156 = arith.mulf %151, %155 : vector<8x64xf32>
    %cst_56 = arith.constant 1.000000e+00 : f32
    %157 = vector.broadcast %cst_56 : f32 to vector<8x64xf32>
    %158 = arith.subf %157, %156 : vector<8x64xf32>
    %159 = arith.mulf %130, %158 : vector<8x64xf32>
    %cst_57 = arith.constant 1.000000e+00 : f32
    %160 = vector.broadcast %cst_57 : f32 to vector<8x64xf32>
    %161 = arith.addf %160, %159 : vector<8x64xf32>
    %162 = arith.mulf %123, %161 : vector<8x64xf32>
    %c0_58 = arith.constant 0 : index
    %c0_59 = arith.constant 0 : index
    %163 = vector.load %arg6[%c0_58, %c0_59] : memref<64x32xf32, #tpu.memory_space<vmem>>, vector<64x32xf32>
    %cst_60 = arith.constant dense<0.000000e+00> : vector<8x32xf32>
    %164 = tpu.matmul %162, %163, %cst_60 {dimension_numbers = #tpu.dot_dimension_numbers<[1], [0], [0], [1], [0, 0, 1, 1], [], []>} : vector<8x64xf32>, vector<64x32xf32>, vector<8x32xf32> -> vector<8x32xf32>
    %165 = vector.broadcast %9 : vector<1x32xf32> to vector<8x32xf32>
    %166 = arith.addf %164, %165 : vector<8x32xf32>
    %167 = arith.addf %166, %117 : vector<8x32xf32>
    %cst_61 = arith.constant dense<0.000000e+00> : vector<8xf32>
    %168 = vector.multi_reduction <add>, %167, %cst_61 [1] : vector<8x32xf32> to vector<8xf32>
    %169 = vector.shape_cast %168 : vector<8xf32> to vector<8x1xf32>
    %cst_62 = arith.constant 3.200000e+01 : f32
    %170 = vector.broadcast %cst_62 : f32 to vector<8x1xf32>
    %171 = arith.divf %169, %170 : vector<8x1xf32>
    %172 = vector.broadcast %171 : vector<8x1xf32> to vector<8x32xf32>
    %173 = arith.subf %167, %172 : vector<8x32xf32>
    %174 = arith.mulf %173, %173 : vector<8x32xf32>
    %cst_63 = arith.constant dense<0.000000e+00> : vector<8xf32>
    %175 = vector.multi_reduction <add>, %174, %cst_63 [1] : vector<8x32xf32> to vector<8xf32>
    %176 = vector.shape_cast %175 : vector<8xf32> to vector<8x1xf32>
    %cst_64 = arith.constant 3.200000e+01 : f32
    %177 = vector.broadcast %cst_64 : f32 to vector<8x1xf32>
    %178 = arith.divf %176, %177 : vector<8x1xf32>
    %179 = vector.broadcast %171 : vector<8x1xf32> to vector<8x32xf32>
    %180 = arith.subf %167, %179 : vector<8x32xf32>
    %cst_65 = arith.constant 9.99999996E-13 : f32
    %181 = vector.broadcast %cst_65 : f32 to vector<8x1xf32>
    %182 = arith.addf %178, %181 : vector<8x1xf32>
    %183 = math.rsqrt %182 : vector<8x1xf32>
    %184 = vector.broadcast %183 : vector<8x1xf32> to vector<8x32xf32>
    %185 = arith.mulf %180, %184 : vector<8x32xf32>
    %186 = vector.broadcast %10 : vector<1x32xf32> to vector<8x32xf32>
    %187 = arith.mulf %185, %186 : vector<8x32xf32>
    %188 = vector.broadcast %11 : vector<1x32xf32> to vector<8x32xf32>
    %189 = arith.addf %187, %188 : vector<8x32xf32>
    %c0_66 = arith.constant 0 : index
    %c0_67 = arith.constant 0 : index
    %190 = vector.load %arg8[%c0_66, %c0_67] : memref<8x32xf32, #tpu.memory_space<vmem>>, vector<8x32xf32>
    tpu.vector_store %arg8[%c0_66, %c0_67], %189 {strides = array<i32>} : memref<8x32xf32, #tpu.memory_space<vmem>>, vector<8x32xf32>,
    return
  }
  func.func @transform_0(%arg0: i32) -> (i32, i32) {
    %c0_i32 = arith.constant 0 : i32
    %c0_i32_0 = arith.constant 0 : i32
    return %arg0, %c0_i32 : i32, i32
  }
  func.func @transform_1(%arg0: i32) -> (i32, i32, i32) {
    %c0_i32 = arith.constant 0 : i32
    %c0_i32_0 = arith.constant 0 : i32
    %c0_i32_1 = arith.constant 0 : i32
    return %arg0, %c0_i32, %c0_i32_0 : i32, i32, i32
  }
  func.func @transform_2(%arg0: i32) -> (i32, i32) {
    %c0_i32 = arith.constant 0 : i32
    %c0_i32_0 = arith.constant 0 : i32
    %c0_i32_1 = arith.constant 0 : i32
    return %c0_i32, %c0_i32_0 : i32, i32
  }
  func.func @transform_3(%arg0: i32) -> (i32, i32) {
    %c0_i32 = arith.constant 0 : i32
    %c0_i32_0 = arith.constant 0 : i32
    %c0_i32_1 = arith.constant 0 : i32
    return %c0_i32, %c0_i32_0 : i32, i32
  }
  func.func @transform_4(%arg0: i32) -> (i32, i32) {
    %c0_i32 = arith.constant 0 : i32
    %c0_i32_0 = arith.constant 0 : i32
    %c0_i32_1 = arith.constant 0 : i32
    return %c0_i32, %c0_i32_0 : i32, i32
  }
  func.func @transform_5(%arg0: i32) -> (i32, i32) {
    %c0_i32 = arith.constant 0 : i32
    %c0_i32_0 = arith.constant 0 : i32
    %c0_i32_1 = arith.constant 0 : i32
    return %c0_i32, %c0_i32_0 : i32, i32
  }
  func.func @transform_6(%arg0: i32) -> (i32, i32) {
    %c0_i32 = arith.constant 0 : i32
    %c0_i32_0 = arith.constant 0 : i32
    %c0_i32_1 = arith.constant 0 : i32
    return %c0_i32, %c0_i32_0 : i32, i32
  }
  func.func @transform_7(%arg0: i32) -> (i32, i32) {
    %c0_i32 = arith.constant 0 : i32
    %c0_i32_0 = arith.constant 0 : i32
    return %arg0, %c0_i32 : i32, i32
  }
}

</mosaic_0001>

<bundles_post_ra>
// kernel: tpu_custom_call.1
= control target key start
LH: loop header
LB: loop body
LE: loop exit
PB: predicated region body
PF: predicated region fallthrough
CT: control target
= control target key end

     0   :  { %s1681_s0 = inlined_call_operand.hbm [shape: f32[16,32], index: 0, kind: input, shape index: {}]   ;;  %s1682_s1 = inlined_call_operand.hbm [shape: f32[2,8,8], index: 1, kind: input, shape index: {}]   ;;  %s1683_s2 = inlined_call_operand.vmem [shape: f32[32,96], index: 2, kind: input, shape index: {}]   ;;  %s1684_s3 = inlined_call_operand.vmem [shape: f32[32,32], index: 3, kind: input, shape index: {}]   ;;  %s1685_s4 = inlined_call_operand.vmem [shape: f32[32,64], index: 4, kind: input, shape index: {}]   ;;  %s1686_s5 = inlined_call_operand.vmem [shape: f32[64,32], index: 5, kind: input, shape index: {}]   ;;  %s1687_s6 = inlined_call_operand.hbm [shape: f32[8,128], index: 6, kind: input, shape index: {}]   ;;  %s1688_s7 = inlined_call_operand.hbm [shape: f32[16,32], index: 7, kind: output, shape index: {}]  }
   0x1   :  { %1694 = sst [smem:[#allocation18_spill]] %s1687_s6 }
   0x2   :  { %12 = vsyncpa [#allocation3], 0 }
   0x3   :  { %14 = vsyncpa [#allocation3 + $0x1], 0 }
   0x4   :  { %15 = vsyncpa [#allocation6], 0 }
   0x5   :  { %17 = vsyncpa [#allocation6 + $0x1], 0 }
   0x6   :  { %18 = vsyncpa [#allocation4], 0 }
   0x7   :  { %20 = vsyncpa [#allocation4 + $0x1], 0  ;;  %s1379_s24 = smov 0   ;;  %s1381_s25 = smov 0  }
   0x8   :  { %s1383_s26 = smov 0   ;;  %s1385_s27 = smov 0  }
   0x9 LB: > { %1695 = sst [smem:[#allocation13_spill]] %s1319_s26  ;;  %s1400_s28 = sadd.s32 4294967295, %s1323_s27   ;;  %s1323_s27 = sphi %s1385_s27, %s1709_s27   ;;  %s1319_s26 = sphi %s1383_s26, %s1711_s26   ;;  %s1315_s25 = sphi %s1381_s25, %s1713_s25   ;;  %s1311_s24 = sphi %s1379_s24, %s1712_s24  }
   0xa   : > { %1696 = sst [smem:[#allocation14_spill]] %s1323_s27  ;;  %s1022_s29 = sadd.s32 4294967294, %s1323_s27  }
   0xb   : > { %p46_p0 = scmp.ne.s32.totalorder %s1315_s25, %s1311_s24  ;;  %p47_p1 = scmp.eq.s32.totalorder %s1400_s28, 0 }
   0xc   : > { %p201_p2 = scmp.eq.s32.totalorder %s1400_s28, 1  ;;  %p207_p3 = scmp.eq.s32.totalorder %s1022_s29, 1 }
   0xd   : > { %p1409_p4 = por %p47_p1, %p46_p0  ;;  %p1023_p5 = scmp.ge.s32.totalorder %s1323_s27, 1 }
   0xe   : > { %p1414_p6 = por %p207_p3, %p46_p0  ;;  %p214_p7 = scmp.lt.s32.totalorder %s1323_s27, 3 }
   0xf   : > { %s1700_s6 = sld [smem:[#allocation18_spill]]  ;;  %s1325_s13 = smov [#allocation7]  }
  0x10   : > { %s1698_s8 = scalar_select %p1414_p6, 1, 0 }
  0x11   : > { %p1422_p8 = pnand %p1023_p5, %p214_p7  ;;  %s240_s14 = sshll.u32 %s1325_s13, 4  ;;  %s241_s14 = int_to_ptr.vmem [resolvable:$true] %s240_s14 }
  0x12   : > { %1699 = sst [smem:[#allocation15_spill]] %s1698_s8  ;;  %s1432_s15 = sadd.s32 1, %s1323_s27  }
  0x13   : > { %p1068_p10 = pneg %p1422_p8  ;;  %1702 = sst [smem:[#allocation16_spill]] %s1432_s15 }
  0x14   : > { %s33_s16 = sadd.s32 1, %s1319_s26  ;;  %s30_s17 = ssub.s32 %s1323_s27, %s1432_s15 }
  0x15   : > { %s238_s11 = sshll.u32 %s1700_s6, 4  ;;  %p1069_p11 = pnand %p1068_p10, %p47_p1  ;;  %s239_s11 = int_to_ptr.hbm [resolvable:$true] %s238_s11 }
  0x16   : > { %p31_p12 = scmp.eq.s32.totalorder %s30_s17, 0  ;;  %p40_p13 = scmp.ne.s32.totalorder %s1319_s26, %s1315_s25 }
  0x17   : > { %1071 = dma.hbm_to_vmem [thread:$0]  (!%p1069_p11), %s239_s11, 128, %s241_s14, [#allocation6]  }
  0x18   : > { %p41_p0 = scmp.eq.s32.totalorder %s1323_s27, 0  ;;  %p1084_p3 = scmp.lt.s32.totalorder %s1323_s27, 2 }
  0x19   : > { %s1442_s18 = scalar_select %p31_p12, %s1319_s26, %s33_s16  }
  0x1a   : > { %p42_p5 = por %p41_p0, %p40_p13  ;;  %p1446_p7 = por %p201_p2, %p40_p13 }
  0x1b   : > { %1703 = sst [smem:[#allocation17_spill]] %s1442_s18  ;;  %s251_s20 = sand.u32 1, %s1319_s26  }
  0x1c   : > { %s1027_s21 = sshll.u32 %s1323_s27, 3  ;;  %s1026_s22 = sshll.u32 %s251_s20, 3 }
  0x1d   : > { %s259_s9 = scalar_lea.hbm %s1681_s0, %s1027_s21  ;;  %s255_s11 = scalar_lea.vmem [#allocation2], %s1026_s22 }
  0x1e   : > { %s261_s10 = sshll.u32 %s259_s9, 4  ;;  %s263_s13 = sshll.u32 %s255_s11, 4  ;;  %s262_s10 = int_to_ptr.hbm [resolvable:$true] %s261_s10  ;;  %s264_s13 = int_to_ptr.vmem [resolvable:$true] %s263_s13 }
  0x1f   : > { %p1457_p10 = pnand %p1084_p3, %p42_p5  ;;  %s278_s6 = scalar_lea.hbm %s1682_s1, %s1027_s21 }
  0x20   : > { %s270_s18 = sand.u32 1, %s1323_s27   ;;  %s252_s26 = scalar_lea.sflag [#allocation3], %s251_s20 }
  0x21   : > { %s1189_s23 = sshra.s32 %s262_s10, 4  ;;  %p1193_p11 = pneg %p1457_p10  ;;  %s1190_s23 = int_to_ptr.hbm [resolvable:$true] %s1189_s23 }
  0x22   : > { %s1191_s29 = scalar_lea.hbm %s1190_s23, 8  ;;  %s1196_s15 = scalar_lea.hbm %s1681_s0, 16 }
  0x23   : > { %p1192_p2 = scmp.ne.s32.totalorder %s1190_s23, %s1191_s29  ;;  %p1197_p0 = scmp.lt.s32.totalorder %s1190_s23, %s1681_s0 }
  0x24   : > { %p1198_p3 = scmp.lt.s32.totalorder %s1196_s15, %s1191_s29 }
  0x25   : > { %p1194_p12 = pnand %p1193_p11, %p1192_p2 }
  0x26   : > { %p1199_p5 = por %p1198_p3, %p1197_p0 }
  0x27   : > { %p1195_p13 = pneg %p1194_p12 }
  0x29   : > { %p1200_p9 = pnand %p1199_p5, %p1195_p13 }
  0x2b   : > { %1203 = shalt.err (!%p1200_p9)
}
  0x2c   : > { %1075 = dma.hbm_to_vmem [thread:$0]  (!%p1457_p10), %s262_s10, 128, %s264_s13, %s252_s26  }
  0x2d   : > { %s280_s20 = sshll.u32 %s278_s6, 4  ;;  %s274_s21 = scalar_lea.vmem [#allocation5], %s1026_s22  ;;  %s281_s20 = int_to_ptr.hbm [resolvable:$true] %s280_s20 }
  0x2e   : > { %s282_s27 = sshll.u32 %s274_s21, 4  ;;  %s271_s8 = scalar_lea.sflag [#allocation6], %s270_s18  ;;  %s283_s27 = int_to_ptr.vmem [resolvable:$true] %s282_s27 }
  0x2f   : > { %s1219_s9 = sshra.s32 %s281_s20, 4  ;;  %s1226_s29 = scalar_lea.hbm %s1682_s1, 16  ;;  %s1220_s9 = int_to_ptr.hbm [resolvable:$true] %s1219_s9 }
  0x30   : > { %s1221_s11 = scalar_lea.hbm %s1220_s9, 8  ;;  %p1227_p9 = scmp.lt.s32.totalorder %s1220_s9, %s1682_s1 }
  0x31   : > { %p1222_p2 = scmp.ne.s32.totalorder %s1220_s9, %s1221_s11  ;;  %p1228_p13 = scmp.lt.s32.totalorder %s1226_s29, %s1221_s11 }
  0x33   : > { %p1224_p12 = pnand %p1222_p2, %p1193_p11  ;;  %p1229_p3 = por %p1228_p13, %p1227_p9 }
  0x35   : > { %p1225_p0 = pneg %p1224_p12 }
  0x37   : > { %p1230_p5 = pnand %p1229_p3, %p1225_p0 }
  0x39   : > { %1233 = shalt.err (!%p1230_p5)
}
  0x3a   : > { %1078 = dma.hbm_to_vmem [thread:$0]  (!%p1457_p10), %s281_s20, 128, %s283_s27, %s271_s8  }
  0x3b   : > { %291 = sbr.rel (%p1422_p8) target bundleno = 2370 (0x942), region = 48  ;;  %s1492_s6 = sand.u32 (!%p1422_p8), 1, %s1315_s25  }
  0x3c   : > { %s1495_s18 = sshll.u32 (!%p1422_p8), %s1492_s6, 3  ;;  %s294_s22 = scalar_lea.sflag (!%p1422_p8), [#allocation3], %s1492_s6 }
  0x3d   : > { %s297_s10 = scalar_lea.vmem (!%p1422_p8), [#allocation2], %s1495_s18 }
  0x40   : > { %1294 = dma.done.wait (%p1409_p4), %s294_s22, 128  }
  0x41   : > { %1296 = vsyncadd (%p1409_p4), %s294_s22, 4294967168  ;;  %s303_s27 = sand.u32 1, %s1400_s28   ;;  %s307_s12 = scalar_lea.vmem [#allocation5], %s1495_s18 }
  0x42   : > { %s304_s8 = scalar_lea.sflag [#allocation6], %s303_s27 }
  0x43   : > { %1298 = dma.done.wait (%p1409_p4), %s304_s8, 128  }
  0x44   : > { %1300 = vsyncadd (%p1409_p4), %s304_s8, 4294967168 }
  0x45   : > { %1302 = dma.done.wait (%p47_p1), [#allocation6], 128  }
  0x46   : > { %1304 = vsyncadd (%p47_p1), [#allocation6], 4294967168  ;;  %v355_v0 = vld [vmem:[%s1683_s2 + $0x18] sm:$0xff]  ;;  %v354_v1 = vld [vmem:[%s1683_s2 + $0x10] sm:$0xff]  ;;  %vm357_vm0 = vcmask 261120   ;;  %s1326_s15 = smov 88  }
  0x47   : > { %373 = vmatpush.msra.mxu0 %v355_v0  ;;  %v353_v2 = vld [vmem:[%s1683_s2 + $0x8] sm:$0xff]  ;;  %v352_v3 = vld [vmem:[%s1683_s2] sm:$0xff]  ;;  %s1327_s23 = smov 96   ;;  %s1328_s29 = smov 120   ;;  %vm384_vm1 = vcmask 64512   ;;  %v350_v16 = vld [vmem:[%s307_s12] sm:$0xff] }
  0x48   : > { %v1525_v4 = vld [vmem:[%s297_s10] sm:$0xff]  ;;  %s1329_s16 = smov 72   ;;  %s1330_s26 = smov 104   ;;  %vm852_vm11 = vcmask 523264  }
  0x49   : > { %374 = vmatpush.msra.mxu0 %v354_v1  ;;  %v1529_v5 = vld [vmem:[#allocation7] sm:$0xff]  ;;  %s1331_s22 = smov 80   ;;  %s1332_s8 = smov 64  }
  0x4a   : > { %v356_v6 = vperm.slane %v1529_v5, 0  ;;  %v446_v9 = vld [vmem:[%s1684_s3] sm:$0xff]  ;;  %s1333_s12 = smov 112   ;;  %s1334_s13 = smov 48  }
  0x4b   : > { %375 = vmatpush.msra.mxu0 %v353_v2  ;;  %554 = vmatpush.msra.mxu3 %v446_v9  ;;  %s1335_s14 = smov 56   ;;  %s1336_s17 = smov 40  }
  0x4c   : > { %s1055_s27 = sshll.u32 %s1400_s28, 3  ;;  %s905_s28 = scalar_lea.sflag [#allocation4], %s1492_s6 }
  0x4d   : > { %376 = vmatpush.msra.mxu0 %v352_v3 }
  0x4e   : > { %1035 = vmatmul.msk.f32.vlgmr.msra.gmra.mxu0 %vm357_vm0, %v1525_v4 }
  0xcb   : > { %v378_v7 = vpop.f32.mrf.mxu0 }
  0xcc   : > { %v1532_v8 = vadd.f32 %v378_v7, %v356_v6  ;;  %v512_v6 = vld [vmem:[%s1684_s3 + $0x8] sm:$0xff]  ;;  %v624_v7 = vld [vmem:[%s1684_s3 + $0x10] sm:$0xff] }
  0xce   : > { %449 = vrot.lane.b32.xlu2 %v1532_v8, %s1326_s15  ;;  %382 = vrot.lane.b32.xlu0 %v1532_v8, %s1327_s23 }
  0xd6   : > { %447 = vrot.lane.b32.xlu2 %v1532_v8, %s1328_s29 }
  0xde   : > { %651 = vrot.lane.b32.xlu2 %v1532_v8, %s1329_s16 }
  0xe6   : > { %649 = vrot.lane.b32.xlu2 %v1532_v8, %s1330_s26 }
  0xee   : > { %561 = vrot.lane.b32.xlu2 %v1532_v8, %s1331_s22 }
 0x128   : > { %v450_v10 = vpop.permute.xlu2 %449 }
 0x129   : > { %1039 = vmatpush.xpose.msk.msrb.mxu0 %vm384_vm1, %v450_v10  ;;  %v714_v10 = vld [vmem:[%s1684_s3 + $0x18] sm:$0xff] }
 0x130   : > { %v448_v11 = vpop.permute.xlu2 %447 }
 0x131   : > { %1040 = vmatmul.msk.f32.vlgmr.msrb.gmra.mxu0 %vm384_vm1, %v448_v11 }
 0x138   : > { %v652_v12 = vpop.permute.xlu2 %651 }
 0x139   : > { %1048 = vmatpush.xpose.msk.msrb.mxu3 %vm384_vm1, %v652_v12 }
 0x140   : > { %v650_v13 = vpop.permute.xlu2 %649  ;;  %v383_v14 = vpop.permute.xlu0 %382 }
 0x141   : > { %1036 = vmatpush.xpose.msk.msra.mxu1 %vm384_vm1, %v383_v14 }
 0x144   : > { %1037 = vmatmul.msk.f32.vlgmr.msra.gmra.mxu1 %vm384_vm1, %v1532_v8 }
 0x145   : > { %531 = vmatpush.msrb.mxu1 %v512_v6 }
 0x147   : > { %643 = vmatpush.msra.mxu1 %v624_v7  ;;  %v844_v7 = vld [vmem:[%s1686_s5 + $0x8] sm:$0xff] }
 0x148   : > { %v562_v15 = vpop.permute.xlu2 %561 }
 0x149   : > { %1044 = vmatpush.xpose.msk.msra.mxu0 %vm384_vm1, %v562_v15 }
 0x1ae   : > { %v472_v17 = vpop.f32.mrf.mxu0 }
 0x1af   : > { %v473_v18 = vadd.f32 %v472_v17, %v350_v16 }
 0x1b1   : > { %v475_v19 = vsel %vm384_vm1, %v473_v18, -inf }
 0x1b2   : > { %476 = vmax.xlane.f32.xlu2 %v475_v19 }
 0x1c1   : > { %v406_v20 = vpop.f32.mrf.mxu1 }
 0x1c2   : > { %v407_v21 = vadd.f32 %v406_v20, %v350_v16 }
 0x1c4   : > { %v409_v22 = vsel %vm384_vm1, %v407_v21, -inf }
 0x1c5   : > { %410 = vmax.xlane.f32.xlu0 %v409_v22  ;;  %v1337_v22 = vmov 32.0  }
 0x225   : > { %v477_v37 = vpop.xlane.xlu2 %476 }
 0x226   : > { %v478_v39 = vsub.f32 %v473_v18, %v477_v37 }
 0x228   : > { %v479_v40 = vmul.f32 1.442695, %v478_v39 }
 0x238   : > { %v411_v23 = vpop.xlane.xlu0 %410 }
 0x239   : > { %v412_v24 = vsub.f32 %v407_v21, %v411_v23 }
 0x23b   : > { %v413_v25 = vmul.f32 1.442695, %v412_v24 }
 0x23d   : > { %1133 = vpow2.f32 %v413_v25 }
 0x243   : > { %v1134_v26 = vpop.eup %1133 }
 0x244   : > { %v415_v27 = vsel %vm384_vm1, %v1134_v26, 0.0 }
 0x245   : > { %416 = vadd.xlane.f32.xlu1 %v415_v27 }
 0x25e   : > { %420 = vrot.lane.b32.xlu1 %v1532_v8, %s1332_s8 }
 0x266   : > { %559 = vrot.lane.b32.xlu1 %v1532_v8, %s1333_s12 }
 0x2b8   : > { %v417_v28 = vpop.xlane.xlu1 %416 }
 0x2b9   : > { %1135 = vrcp.f32 %v417_v28 }
 0x2ba   : > { %1137 = vpow2.f32 %v479_v40 }
 0x2bf   : > { %v1136_v29 = vpop.eup %1135 }
 0x2c0   : > { %v419_v31 = vmul.f32 %v1136_v29, %v1134_v26  ;;  %v1138_v47 = vpop.eup %1137 }
 0x2c1   : > { %v481_v48 = vsel %vm384_vm1, %v1138_v47, 0.0 }
 0x2d0   : > { %v421_v30 = vpop.permute.xlu1 %420 }
 0x2d1   : > { %441 = vmatpush.msra.mxu2 %v421_v30 }
 0x2d2   : > { %1038 = vmatmul.msk.f32.vlgmr.msra.gmra.mxu2 %vm384_vm1, %v419_v31 }
 0x2d8   : > { %v560_v32 = vpop.permute.xlu1 %559 }
 0x2d9   : > { %1045 = vmatmul.msk.f32.vlgmr.msra.gmra.mxu0 %vm384_vm1, %v560_v32 }
 0x355   : > { %v443_v33 = vpop.f32.mrf.mxu2 }
 0x356   : > { %1043 = vmatmul.msk.f32.vlgmr.msra.gmra.mxu3 %vm384_vm1, %v443_v33  ;;  %v584_v34 = vpop.f32.mrf.mxu0  ;;  %v778_v33 = vld [vmem:[%s1685_s4 + $0x18] sm:$0xff] }
 0x357   : > { %v585_v35 = vadd.f32 %v584_v34, %v350_v16  ;;  %v777_v34 = vld [vmem:[%s1685_s4 + $0x10] sm:$0xff] }
 0x359   : > { %v587_v36 = vsel %vm384_vm1, %v585_v35, -inf }
 0x35a   : > { %588 = vmax.xlane.f32.xlu1 %v587_v36  ;;  %v775_v36 = vld [vmem:[%s1685_s4] sm:$0xff] }
 0x35e   : > { %1049 = vmatmul.msk.f32.vlgmr.msrb.gmra.mxu3 %vm384_vm1, %v650_v13 }
 0x373   : > { %598 = vrot.lane.b32.xlu1 %v1532_v8, %s1334_s13  ;;  %s915_s13 = scalar_lea.hbm %s1688_s7, %s1055_s27 }
 0x374   : > { %s919_s20 = sshll.u32 %s915_s13, 4  ;;  %s920_s20 = int_to_ptr.hbm [resolvable:$true] %s919_s20 }
 0x375   : > { %s1263_s21 = sshra.s32 %s920_s20, 4  ;;  %s1264_s21 = int_to_ptr.hbm [resolvable:$true] %s1263_s21 }
 0x376   : > { %s1265_s9 = scalar_lea.hbm %s1264_s21, 8  ;;  %p1270_p10 = scmp.lt.s32.totalorder %s1264_s21, %s1688_s7 }
 0x377   : > { %p1266_p1 = scmp.ne.s32.totalorder %s1264_s21, %s1265_s9 }
 0x379   : > { %p1267_p4 = pnand %p1266_p1, %p1446_p7 }
 0x37b   : > { %p1268_p8 = pneg %p1267_p4 }
 0x3cd   : > { %v589_v41 = vpop.xlane.xlu1 %588 }
 0x3ce   : > { %v590_v44 = vsub.f32 %v585_v35, %v589_v41  ;;  %v776_v35 = vld [vmem:[%s1685_s4 + $0x8] sm:$0xff] }
 0x3d0   : > { %v591_v46 = vmul.f32 1.442695, %v590_v44 }
 0x3d2   : > { %1139 = vpow2.f32 %v591_v46  ;;  %v771_v46 = vperm.slane %v1529_v5, 3 }
 0x3d8   : > { %v1140_v49 = vpop.eup %1139 }
 0x3d9   : > { %v1563_v38 = vpop.f32.mrf.mxu3  ;;  %v593_v50 = vsel %vm384_vm1, %v1140_v49, 0.0 }
 0x3e1   : > { %v674_v42 = vpop.f32.mrf.mxu3 }
 0x3e2   : > { %v675_v43 = vadd.f32 %v674_v42, %v350_v16  ;;  %v739_v16 = vperm.slane %v1529_v5, 2 }
 0x3e4   : > { %v677_v45 = vsel %vm384_vm1, %v675_v43, -inf }
 0x3e5   : > { %678 = vmax.xlane.f32.xlu0 %v677_v45  ;;  %v599_v61 = vpop.permute.xlu1 %598 }
 0x3ed   : > { %482 = vadd.xlane.f32.xlu0 %v481_v48 }
 0x3f5   : > { %594 = vadd.xlane.f32.xlu0 %v593_v50 }
 0x409   : > { %486 = vrot.lane.b32.xlu0 %v1532_v8, %s1335_s14  ;;  %s348_s14 = scalar_lea.vmem [#allocation8], %s1495_s18  ;;  %s1269_s18 = scalar_lea.hbm %s1688_s7, 16 }
 0x40a   : > { %p1271_p11 = scmp.lt.s32.totalorder %s1269_s18, %s1265_s9 }
 0x40c   : > { %p1272_p2 = por %p1271_p11, %p1270_p10 }
 0x40e   : > { %p1273_p12 = pnand %p1272_p2, %p1268_p8 }
 0x458   : > { %v679_v51 = vpop.xlane.xlu0 %678 }
 0x459   : > { %v680_v52 = vsub.f32 %v675_v43, %v679_v51 }
 0x45b   : > { %v681_v53 = vmul.f32 1.442695, %v680_v52  ;;  %v779_v52 = vperm.slane %v1529_v5, 1 }
 0x45d   : > { %1141 = vpow2.f32 %v681_v53 }
 0x460   : > { %v483_v56 = vpop.xlane.xlu0 %482 }
 0x461   : > { %1143 = vrcp.f32 %v483_v56 }
 0x463   : > { %v1142_v54 = vpop.eup %1141 }
 0x464   : > { %v683_v55 = vsel %vm384_vm1, %v1142_v54, 0.0 }
 0x465   : > { %684 = vadd.xlane.f32.xlu2 %v683_v55 }
 0x467   : > { %v1144_v58 = vpop.eup %1143 }
 0x468   : > { %v595_v57 = vpop.xlane.xlu0 %594  ;;  %v485_v60 = vmul.f32 %v1144_v58, %v1138_v47 }
 0x469   : > { %1145 = vrcp.f32 %v595_v57 }
 0x46f   : > { %v1146_v62 = vpop.eup %1145 }
 0x470   : > { %v597_v63 = vmul.f32 %v1146_v62, %v1140_v49  ;;  %v773_v49 = vperm.slane %v1529_v5, 4  ;;  %v847_v62 = vld [vmem:[%s1686_s5 + $0x20] sm:$0xff] }
 0x47b   : > { %v487_v59 = vpop.permute.xlu0 %486 }
 0x47c   : > { %507 = vmatpush.msrb.mxu2 %v487_v59  ;;  %v850_v59 = vld [vmem:[%s1686_s5 + $0x38] sm:$0xff] }
 0x47d   : > { %688 = vrot.lane.b32.xlu2 %v1532_v8, %s1336_s17  ;;  %1041 = vmatmul.msk.f32.vlgmr.msrb.gmra.mxu2 %vm384_vm1, %v485_v60  ;;  %v849_v60 = vld [vmem:[%s1686_s5 + $0x30] sm:$0xff]  ;;  %s917_s17 = sshll.u32 %s348_s14, 4  ;;  %s918_s17 = int_to_ptr.vmem [resolvable:$true] %s917_s17 }
 0x47e   : > { %619 = vmatpush.msra.mxu2 %v599_v61  ;;  %864 = vmatpush.msra.mxu3 %v850_v59  ;;  %v848_v61 = vld [vmem:[%s1686_s5 + $0x28] sm:$0xff] }
 0x480   : > { %733 = vmatpush.msrb.mxu2 %v714_v10  ;;  %865 = vmatpush.msra.mxu3 %v849_v60  ;;  %v843_v10 = vld [vmem:[%s1686_s5] sm:$0xff] }
 0x482   : > { %866 = vmatpush.msra.mxu3 %v848_v61 }
 0x484   : > { %867 = vmatpush.msra.mxu3 %v847_v62 }
 0x485   : > { %1046 = vmatmul.msk.f32.vlgmr.msra.gmra.mxu2 %vm384_vm1, %v597_v63 }
 0x4d8   : > { %v685_v0 = vpop.xlane.xlu2 %684 }
 0x4d9   : > { %1147 = vrcp.f32 %v685_v0  ;;  %v846_v0 = vld [vmem:[%s1686_s5 + $0x18] sm:$0xff] }
 0x4da   : > { %1149 = vrcp.f32 %v1337_v22  ;;  %868 = vmatpush.msra.mxu3 %v846_v0 }
 0x4df   : > { %v1148_v1 = vpop.eup %1147 }
 0x4e0   : > { %v687_v2 = vmul.f32 %v1148_v1, %v1142_v54  ;;  %v689_v3 = vpop.permute.xlu2 %688  ;;  %v1150_v23 = vpop.eup %1149 }
 0x4e1   : > { %709 = vmatpush.msrb.mxu0 %v689_v3  ;;  %v746_v24 = vmul.f32 32.0, %v1150_v23  ;;  %vm750_vm2 = vweird.f32 %v1150_v23 }
 0x4e2   : > { %1050 = vmatmul.msk.f32.vlgmr.msrb.gmra.mxu0 %vm384_vm1, %v687_v2  ;;  %v845_v2 = vld [vmem:[%s1686_s5 + $0x10] sm:$0xff] }
 0x4e3   : > { %v747_v25 = vsub.f32 1.0, %v746_v24  ;;  %869 = vmatpush.msra.mxu3 %v845_v2 }
 0x4e5   : > { %v748_v26 = vmul.f32 %v1150_v23, %v747_v25  ;;  %870 = vmatpush.msra.mxu3 %v844_v7 }
 0x4e7   : > { %v749_v27 = vadd.f32 %v1150_v23, %v748_v26  ;;  %871 = vmatpush.msra.mxu3 %v843_v10 }
 0x4e9   : > { %v1590_v28 = vsel %vm750_vm2, %v1150_v23, %v749_v27 }
 0x500   : > { %v509_v8 = vpop.f32.mrf.mxu2 }
 0x501   : > { %1042 = vmatmul.msk.f32.vlgmr.msrb.gmra.mxu1 %vm384_vm1, %v509_v8 }
 0x502   : > { %795 = vmatpush.msrb.mxu1 %v778_v33 }
 0x504   : > { %796 = vmatpush.msrb.mxu1 %v777_v34 }
 0x506   : > { %797 = vmatpush.msrb.mxu1 %v776_v35 }
 0x508   : > { %v621_v9 = vpop.f32.mrf.mxu2  ;;  %798 = vmatpush.msrb.mxu1 %v775_v36  ;;  %v851_v36 = vperm.slane %v1529_v5, 5 }
 0x509   : > { %1047 = vmatmul.msk.f32.vlgmr.msra.gmra.mxu1 %vm384_vm1, %v621_v9 }
 0x55f   : > { %v711_v11 = vpop.f32.mrf.mxu0 }
 0x560   : > { %1051 = vmatmul.msk.f32.vlgmr.msrb.gmra.mxu2 %vm384_vm1, %v711_v11 }
 0x57e   : > { %v533_v12 = vpop.f32.mrf.mxu1 }
 0x57f   : > { %v557_v14 = vadd.f32 %v1563_v38, %v533_v12 }
 0x586   : > { %v645_v13 = vpop.f32.mrf.mxu1 }
 0x587   : > { %v648_v15 = vadd.f32 %v645_v13, %v557_v14 }
 0x5e3   : > { %v735_v17 = vpop.f32.mrf.mxu2 }
 0x5e4   : > { %v738_v18 = vadd.f32 %v735_v17, %v648_v15 }
 0x5e6   : > { %v740_v19 = vadd.f32 %v739_v16, %v738_v18 }
 0x5e8   : > { %v741_v20 = vadd.f32 %v740_v19, %v1525_v4 }
 0x5ea   : > { %v742_v21 = vsel %vm357_vm0, %v741_v20, 0.0 }
 0x5eb   : > { %743 = vadd.xlane.f32.xlu0 %v742_v21 }
 0x65e   : > { %v744_v29 = vpop.xlane.xlu0 %743 }
 0x65f   : > { %v752_v30 = vmul.f32 %v1590_v28, %v744_v29 }
 0x661   : > { %v753_v31 = vsub.f32 %v741_v20, %v752_v30 }
 0x663   : > { %v754_v32 = vmul.f32 %v753_v31, %v753_v31 }
 0x665   : > { %v755_v4 = vsel %vm357_vm0, %v754_v32, 0.0 }
 0x666   : > { %756 = vadd.xlane.f32.xlu1 %v755_v4 }
 0x6d9   : > { %v757_v37 = vpop.xlane.xlu1 %756 }
 0x6da   : > { %v758_v38 = vmul.f32 %v757_v37, %v1590_v28 }
 0x6dc   : > { %v759_v39 = vadd.f32 1e-12, %v758_v38 }
 0x6de   : > { %1151 = vrsqrt.f32 %v759_v39  ;;  %vm766_vm4 = vweird.f32 %v759_v39 }
 0x6e4   : > { %v1152_v40 = vpop.eup %1151 }
 0x6e5   : > { %v761_v41 = vmul.f32 %v1152_v40, %v759_v39  ;;  %vm767_vm3 = vweird.f32 %v1152_v40 }
 0x6e6   : > { %vm768_vm5 = vmor %vm766_vm4, %vm767_vm3 }
 0x6e7   : > { %v762_v42 = vmul.f32 %v1152_v40, %v761_v41 }
 0x6e9   : > { %v763_v43 = vmul.f32 0.5, %v762_v42 }
 0x6eb   : > { %v764_v44 = vsub.f32 1.5, %v763_v43 }
 0x6ed   : > { %v765_v45 = vmul.f32 %v1152_v40, %v764_v44 }
 0x6ef   : > { %v769_v47 = vsel %vm768_vm5, %v1152_v40, %v765_v45 }
 0x6f0   : > { %v770_v48 = vmul.f32 %v769_v47, %v753_v31  ;;  %v1338_v31 = vmov -1.0  }
 0x6f2   : > { %v772_v50 = vmul.f32 %v771_v46, %v770_v48 }
 0x6f4   : > { %v1609_v51 = vadd.f32 %v773_v49, %v772_v50 }
 0x6f6   : > { %1052 = vmatmul.msk.f32.vlgmr.msrb.gmra.mxu1 %vm357_vm0, %v1609_v51 }
 0x773   : > { %v800_v53 = vpop.f32.mrf.mxu1 }
 0x774   : > { %v801_v54 = vadd.f32 %v800_v53, %v779_v52 }
 0x776   : > { %v804_v55 = vmul.f32 0.70710677, %v801_v54  ;;  %v803_v33 = vmul.f32 0.5, %v801_v54 }
 0x778   : > { %v807_v56 = vand.u32 2147483647, %v804_v55  ;;  %vm805_vm10 = vcmp.ge.f32.partialorder %v804_v55, 0.0  ;;  %v899_v55 = vperm.slane %v1529_v5, 6 }
 0x779   : > { %v806_v32 = vsel %vm805_vm10, 1.0, %v1338_v31 }
 0x77a   : > { %v808_v57 = vmul.f32 0.3275911, %v807_v56  ;;  %v834_v15 = vsub.f32 0.0, %v807_v56 }
 0x77c   : > { %v809_v58 = vadd.f32 1.0, %v808_v57  ;;  %v835_v18 = vmul.f32 %v834_v15, %v807_v56  ;;  %v901_v57 = vperm.slane %v1529_v5, 7 }
 0x77e   : > { %1153 = vrcp.f32 %v809_v58  ;;  %v821_v6 = vand.u32 2147483648, %v809_v58  ;;  %v819_v9 = vand.u32 2147483647, %v809_v58  ;;  %vm815_vm7 = vweird.f32 %v809_v58 }
 0x77f   : > { %v836_v21 = vmul.f32 1.442695, %v835_v18 }
 0x780   : > { %v822_v12 = vor.u32 1.1754944e-38, %v821_v6  ;;  %vm820_vm9 = vcmp.eq.f32.partialorder %v819_v9, 8.507059e+37 }
 0x781   : > { %1155 = vpow2.f32 %v836_v21 }
 0x784   : > { %v1154_v63 = vpop.eup %1153 }
 0x785   : > { %v811_v1 = vmul.f32 %v1154_v63, %v809_v58  ;;  %vm816_vm6 = vweird.f32 %v1154_v63 }
 0x786   : > { %vm817_vm8 = vmor %vm815_vm7, %vm816_vm6 }
 0x787   : > { %v812_v3 = vsub.f32 1.0, %v811_v1  ;;  %v1156_v27 = vpop.eup %1155 }
 0x789   : > { %v813_v8 = vmul.f32 %v1154_v63, %v812_v3 }
 0x78b   : > { %v814_v11 = vadd.f32 %v1154_v63, %v813_v8 }
 0x78d   : > { %v818_v13 = vsel %vm817_vm8, %v1154_v63, %v814_v11 }
 0x78e   : > { %v823_v14 = vsel %vm820_vm9, %v822_v12, %v818_v13 }
 0x78f   : > { %v825_v16 = vmul.f32 1.0614054, %v823_v14 }
 0x791   : > { %v826_v17 = vadd.f32 -1.4531521, %v825_v16 }
 0x793   : > { %v827_v19 = vmul.f32 %v826_v17, %v823_v14 }
 0x795   : > { %v828_v20 = vadd.f32 1.4214138, %v827_v19 }
 0x797   : > { %v829_v22 = vmul.f32 %v828_v20, %v823_v14 }
 0x799   : > { %v830_v23 = vadd.f32 -0.28449672, %v829_v22 }
 0x79b   : > { %v831_v24 = vmul.f32 %v830_v23, %v823_v14 }
 0x79d   : > { %v832_v25 = vadd.f32 0.2548296, %v831_v24 }
 0x79f   : > { %v833_v26 = vmul.f32 %v832_v25, %v823_v14 }
 0x7a1   : > { %v838_v29 = vmul.f32 %v1156_v27, %v833_v26 }
 0x7a3   : > { %v839_v30 = vsub.f32 1.0, %v838_v29 }
 0x7a5   : > { %v840_v4 = vmul.f32 %v839_v30, %v806_v32 }
 0x7a7   : > { %v841_v34 = vadd.f32 1.0, %v840_v4 }
 0x7a9   : > { %v842_v35 = vmul.f32 %v841_v34, %v803_v33 }
 0x7ab   : > { %1053 = vmatmul.msk.f32.vlgmr.msra.gmra.mxu3 %vm852_vm11, %v842_v35 }
 0x82e   : > { %v873_v37 = vpop.f32.mrf.mxu3 }
 0x82f   : > { %v874_v38 = vadd.f32 %v873_v37, %v851_v36 }
 0x831   : > { %v876_v39 = vadd.f32 %v874_v38, %v1609_v51 }
 0x833   : > { %v877_v40 = vsel %vm357_vm0, %v876_v39, 0.0 }
 0x834   : > { %878 = vadd.xlane.f32.xlu2 %v877_v40 }
 0x8a7   : > { %v879_v41 = vpop.xlane.xlu2 %878 }
 0x8a8   : > { %v880_v42 = vmul.f32 %v879_v41, %v1590_v28 }
 0x8aa   : > { %v881_v43 = vsub.f32 %v876_v39, %v880_v42 }
 0x8ac   : > { %v882_v44 = vmul.f32 %v881_v43, %v881_v43 }
 0x8ae   : > { %v883_v45 = vsel %vm357_vm0, %v882_v44, 0.0 }
 0x8af   : > { %884 = vadd.xlane.f32.xlu0 %v883_v45 }
 0x922   : > { %v885_v46 = vpop.xlane.xlu0 %884 }
 0x923   : > { %v886_v47 = vmul.f32 %v885_v46, %v1590_v28 }
 0x925   : > { %v887_v48 = vadd.f32 1e-12, %v886_v47 }
 0x927   : > { %1157 = vrsqrt.f32 %v887_v48  ;;  %vm894_vm13 = vweird.f32 %v887_v48 }
 0x92d   : > { %v1158_v49 = vpop.eup %1157 }
 0x92e   : > { %v889_v50 = vmul.f32 %v1158_v49, %v887_v48  ;;  %vm895_vm12 = vweird.f32 %v1158_v49 }
 0x92f   : > { %vm896_vm14 = vmor %vm894_vm13, %vm895_vm12 }
 0x930   : > { %v890_v51 = vmul.f32 %v1158_v49, %v889_v50 }
 0x932   : > { %v891_v52 = vmul.f32 0.5, %v890_v51 }
 0x934   : > { %v892_v53 = vsub.f32 1.5, %v891_v52 }
 0x936   : > { %v893_v54 = vmul.f32 %v1158_v49, %v892_v53 }
 0x938   : > { %v897_v28 = vsel %vm896_vm14, %v1158_v49, %v893_v54 }
 0x939   : > { %v898_v56 = vmul.f32 %v897_v28, %v881_v43 }
 0x93b   : > { %v900_v58 = vmul.f32 %v899_v55, %v898_v56 }
 0x93d   : > { %v902_v59 = vadd.f32 %v901_v57, %v900_v58 }
 0x93f   : > { %903 = vst.msk [vmem:[%s348_s14] sm:$0xff] %vm357_vm0, %v902_v59 }
 0x940   : > { %1276 = shalt.err (!%p1273_p12)
}
 0x941   : > { %1066 = dma.vmem_to_hbm [thread:$0]  (%p1446_p7), %s918_s17, 128, %s920_s20, %s905_s28  }
 0x942 PF: > { %s1707_s29 = sld [smem:[#allocation14_spill]]  ;;  %s931_s16 = sand.u32 1, %s1311_s24  }
 0x943   : > { %s932_s26 = scalar_lea.sflag [#allocation4], %s931_s16 }
 0x948   : > { %p1708_p0 = scmp.ge.s32.totalorder %s1707_s29, 2 }
 0x94a   : > { %p1080_p9 = pnand %p1708_p0, %p1414_p6 }
 0x94c   : > { %p1081_p13 = pneg %p1080_p9 }
 0x94e   : > { %1306 = dma.done.wait (%p1081_p13), %s932_s26, 128  }
 0x94f   : > { %1308 = vsyncadd (%p1081_p13), %s932_s26, 4294967168  ;;  %s1709_s27 = sld [smem:[#allocation16_spill]]  ;;  %s1712_s24 = smov %s1315_s25 }
 0x950   : > { %s1710_s22 = sld [smem:[#allocation13_spill]] }
 0x951   : > { %s1711_s26 = sld [smem:[#allocation17_spill]] }
 0x955   : > { %p23_p3 = scmp.ge.s32.totalorder %s1709_s27, 4  }
 0x956   : > { %s1713_s25 = smov %s1710_s22 }
 0x957   :  { %25 = sbr.rel (!%p23_p3) target bundleno = 9 (0x9), region = 110 }
 0x95c   :  { %938 = vsyncpa [#allocation3], 1 }
 0x95d   :  { %940 = vsyncpa [#allocation3 + $0x1], 1 }
 0x95e   :  { %941 = vsyncpa [#allocation6], 1 }
 0x95f   :  { %943 = vsyncpa [#allocation6 + $0x1], 1 }
 0x960   :  { %944 = vsyncpa [#allocation4], 1 }
 0x961   :  { %946 = vsyncpa [#allocation4 + $0x1], 1 }

</bundles_post_ra>
